<compile_context>
chip_gen: v7x
topology: tpu7x:2x2x1
jax: 0.10.0
libtpu: 0.0.40
codegen_flags: <defaults>
</compile_context>

<pallas_src>
import jax
import jax.numpy as jnp
from jax.experimental import pallas as pl
from jax.experimental.pallas import tpu as pltpu

_NEG_BIG = -1e30  # "minus infinity" for padded class columns (avoids inf-arith)


def binary_cls_kernel(x_ref, w1_ref, b1_ref, w2_ref, b2_ref, o_ref):
    # x: [bt, D], w1: [D, H], b1: [1, H], w2: [H, Cp], b2: [1, Cp], o: [bt, Cp]
    x = x_ref[...]

    # hid = tanh(x @ W1 + b1)   (MXU dot, f32 accumulation; tanh on the EUP)
    hid = jnp.tanh(
        jnp.dot(x, w1_ref[...], preferred_element_type=jnp.float32) + b1_ref[...]
    )

    # logits = hid @ W2 + b2 over the lane-padded class dim.  Padded columns
    # have zero weights and a -1e30 bias, so they contribute exp(-huge)=0 to
    # the softmax sum and never win the max.
    logits = (
        jnp.dot(hid, w2_ref[...], preferred_element_type=jnp.float32) + b2_ref[...]
    )

    # Numerically stable log_softmax over the last (class) axis.
    m = jnp.max(logits, axis=-1, keepdims=True)
    shifted = logits - m
    lse = jnp.log(jnp.sum(jnp.exp(shifted), axis=-1, keepdims=True))
    o_ref[...] = (shifted - lse).astype(o_ref.dtype)


def binary_cls_forward(cls_repr, w1, b1, w2, b2, *, b_tile=512, lane=128):
    """Forward pass of the BinaryCls head.

    cls_repr : [B, bert_out_dim] float32 (BERT pooler output)
    w1       : [bert_out_dim, hidden_dim]   (pre-transposed nn.Linear weight)
    b1       : [hidden_dim]
    w2       : [hidden_dim, cls_dim]        (pre-transposed nn.Linear weight)
    b2       : [cls_dim]

    Dropout(p=0.1) is an identity at inference time and is elided.
    Returns [B, cls_dim] float32 log-probabilities.
    """
    B, D = cls_repr.shape
    H = w1.shape[1]
    C = w2.shape[1]

    # ---- lane-dense output: pad class dim up to a multiple of 128 lanes ----
    C_pad = max(lane, pl.cdiv(C, lane) * lane)
    w2_pad = jnp.zeros((H, C_pad), w2.dtype).at[:, :C].set(w2)
    b2_pad = jnp.full((1, C_pad), _NEG_BIG, jnp.float32).at[0, :C].set(b2)
    b1_2d = b1.reshape(1, H)

    # ---- batch tiling: sublane-aligned, VMEM-budget friendly on v7x --------
    # (bt, D) f32 double-buffered + resident weights stays well under the
    # 32 MiB default scoped VMEM even at bt=512, D=1024.
    bt = min(b_tile, max(8, pl.cdiv(B, 8) * 8))
    B_pad = pl.cdiv(B, bt) * bt
    x = cls_repr
    if B_pad != B:
        x = jnp.zeros((B_pad, D), cls_repr.dtype).at[:B].set(cls_repr)

    grid = (B_pad // bt,)

    itemsize = 4
    cost = pl.CostEstimate(
        flops=2 * B_pad * D * H + 2 * B_pad * H * C_pad,
        transcendentals=B_pad * H + B_pad * C_pad,  # tanh + exp/log
        bytes_accessed=(
            x.size + w1.size + b1_2d.size + w2_pad.size + b2_pad.size
            + B_pad * C_pad
        ) * itemsize,
    )

    out_pad = pl.pallas_call(
        binary_cls_kernel,
        out_shape=jax.ShapeDtypeStruct((B_pad, C_pad), jnp.float32),
        grid_spec=pltpu.PrefetchScalarGridSpec(
            num_scalar_prefetch=0,
            grid=grid,
            in_specs=[
                # activations: tiled over the batch grid axis
                pl.BlockSpec((bt, D), lambda i: (i, 0)),
                # weights / biases: same block every step -> DMA'd once, resident
                pl.BlockSpec((D, H), lambda i: (0, 0)),
                pl.BlockSpec((1, H), lambda i: (0, 0)),
                pl.BlockSpec((H, C_pad), lambda i: (0, 0)),
                pl.BlockSpec((1, C_pad), lambda i: (0, 0)),
            ],
            out_specs=pl.BlockSpec((bt, C_pad), lambda i: (i, 0)),
        ),
        compiler_params=pltpu.CompilerParams(
            # independent batch tiles -> shard across TCs on v7x; harmless on
            # single-TC v5e/v6e.
            dimension_semantics=("parallel",),
        ),
        cost_estimate=cost,
    )(x, w1, b1_2d, w2_pad, b2_pad)

    # Strip batch padding and the lane padding of the class dim.
    return out_pad[:B, :C]


def reference_forward(cls_repr, w1, b1, w2, b2):
    hid = jnp.tanh(cls_repr @ w1 + b1)
    logits = hid @ w2 + b2
    return jax.nn.log_softmax(logits, axis=-1)


def _make_inputs(key, B, D, H, C):
    k_x, k_w1, k_b1, k_w2, k_b2 = jax.random.split(key, 5)
    cls_repr = jax.random.normal(k_x, (B, D), dtype=jnp.float32)
    # nn.Linear stores (out, in); we keep weights pre-transposed as (in, out).
    w1 = jax.random.normal(k_w1, (D, H), dtype=jnp.float32) * (1.0 / jnp.sqrt(D))
    b1 = jax.random.normal(k_b1, (H,), dtype=jnp.float32) * 0.01
    w2 = jax.random.normal(k_w2, (H, C), dtype=jnp.float32) * (1.0 / jnp.sqrt(H))
    b2 = jax.random.normal(k_b2, (C,), dtype=jnp.float32) * 0.01
    return cls_repr, w1, b1, w2, b2


if __name__ == "__main__":
    key = jax.random.PRNGKey(0)

    # --- shapes implied by the module: batch=8, bert_out_dim=128, hidden=32,
    #     cls_dim=4 (single tile path) ---
    B, D, H, C = 8, 128, 32, 4
    cls_repr, w1, b1, w2, b2 = _make_inputs(key, B, D, H, C)

    out = binary_cls_forward(cls_repr, w1, b1, w2, b2)
    out = jax.block_until_ready(out)
    ref = reference_forward(cls_repr, w1, b1, w2, b2)
    assert out.shape == (B, C)
    assert jnp.allclose(out, ref, atol=1e-4, rtol=1e-4), "mismatch vs reference"

    # --- exercise the batched/gridded path (non-multiple-of-tile batch) ---
    B2, D2 = 200, 256
    key2 = jax.random.PRNGKey(1)
    cls2, w1b, b1b, w2b, b2b = _make_inputs(key2, B2, D2, H, C)
    out2 = binary_cls_forward(cls2, w1b, b1b, w2b, b2b, b_tile=64)
    out2 = jax.block_until_ready(out2)
    ref2 = reference_forward(cls2, w1b, b1b, w2b, b2b)
    assert out2.shape == (B2, C)
    assert jnp.allclose(out2, ref2, atol=1e-4, rtol=1e-4), "mismatch vs reference (grid)"

    print("KERNEL_OK")
</pallas_src>

<mosaic_0001>
module attributes {stable_mosaic.version = 11 : i64} {
  func.func @binary_cls_kernel(%arg0: i32, %arg1: memref<8x128xf32, #tpu.memory_space<vmem>>, %arg2: memref<128x32xf32, #tpu.memory_space<vmem>>, %arg3: memref<1x32xf32, #tpu.memory_space<vmem>>, %arg4: memref<32x128xf32, #tpu.memory_space<vmem>>, %arg5: memref<1x128xf32, #tpu.memory_space<vmem>>, %arg6: memref<8x128xf32, #tpu.memory_space<vmem>>) attributes {dimension_semantics = [#tpu.dimension_semantics<parallel>], iteration_bounds = array<i64: 1>, scalar_prefetch = 0 : i64, scratch_operands = 0 : i64, tpu.core_type = #tpu.core_type<tc>, window_params = [{transform_indices = @transform_0, window_bounds = array<i64: 8, 128>}, {pipeline_mode = #tpu.pipeline_mode<synchronous>, transform_indices = @transform_1, window_bounds = array<i64: 128, 32>}, {pipeline_mode = #tpu.pipeline_mode<synchronous>, transform_indices = @transform_2, window_bounds = array<i64: 1, 32>}, {pipeline_mode = #tpu.pipeline_mode<synchronous>, transform_indices = @transform_3, window_bounds = array<i64: 32, 128>}, {pipeline_mode = #tpu.pipeline_mode<synchronous>, transform_indices = @transform_4, window_bounds = array<i64: 1, 128>}, {transform_indices = @transform_5, window_bounds = array<i64: 8, 128>}]} {
    %c0 = arith.constant 0 : index
    %c0_0 = arith.constant 0 : index
    %0 = vector.load %arg1[%c0, %c0_0] : memref<8x128xf32, #tpu.memory_space<vmem>>, vector<8x128xf32>
    %c0_1 = arith.constant 0 : index
    %c0_2 = arith.constant 0 : index
    %1 = vector.load %arg2[%c0_1, %c0_2] : memref<128x32xf32, #tpu.memory_space<vmem>>, vector<128x32xf32>
    %cst = arith.constant dense<0.000000e+00> : vector<8x32xf32>
    %2 = tpu.matmul %0, %1, %cst {dimension_numbers = #tpu.dot_dimension_numbers<[1], [0], [0], [1], [0, 0, 1, 1], [], []>} : vector<8x128xf32>, vector<128x32xf32>, vector<8x32xf32> -> vector<8x32xf32>
    %c0_3 = arith.constant 0 : index
    %c0_4 = arith.constant 0 : index
    %3 = vector.load %arg3[%c0_3, %c0_4] : memref<1x32xf32, #tpu.memory_space<vmem>>, vector<1x32xf32>
    %4 = vector.broadcast %3 : vector<1x32xf32> to vector<8x32xf32>
    %5 = arith.addf %2, %4 : vector<8x32xf32>
    %6 = math.tanh %5 : vector<8x32xf32>
    %c0_5 = arith.constant 0 : index
    %c0_6 = arith.constant 0 : index
    %7 = vector.load %arg4[%c0_5, %c0_6] : memref<32x128xf32, #tpu.memory_space<vmem>>, vector<32x128xf32>
    %cst_7 = arith.constant dense<0.000000e+00> : vector<8x128xf32>
    %8 = tpu.matmul %6, %7, %cst_7 {dimension_numbers = #tpu.dot_dimension_numbers<[1], [0], [0], [1], [0, 0, 1, 1], [], []>} : vector<8x32xf32>, vector<32x128xf32>, vector<8x128xf32> -> vector<8x128xf32>
    %c0_8 = arith.constant 0 : index
    %c0_9 = arith.constant 0 : index
    %9 = vector.load %arg5[%c0_8, %c0_9] : memref<1x128xf32, #tpu.memory_space<vmem>>, vector<1x128xf32>
    %10 = vector.broadcast %9 : vector<1x128xf32> to vector<8x128xf32>
    %11 = arith.addf %8, %10 : vector<8x128xf32>
    %cst_10 = arith.constant dense<0xFF800000> : vector<8xf32>
    %12 = vector.multi_reduction <maximumf>, %11, %cst_10 [1] : vector<8x128xf32> to vector<8xf32>
    %13 = vector.shape_cast %12 : vector<8xf32> to vector<8x1xf32>
    %14 = vector.broadcast %13 : vector<8x1xf32> to vector<8x128xf32>
    %15 = arith.subf %11, %14 : vector<8x128xf32>
    %16 = math.exp %15 : vector<8x128xf32>
    %cst_11 = arith.constant dense<0.000000e+00> : vector<8xf32>
    %17 = vector.multi_reduction <add>, %16, %cst_11 [1] : vector<8x128xf32> to vector<8xf32>
    %18 = vector.shape_cast %17 : vector<8xf32> to vector<8x1xf32>
    %19 = math.log %18 : vector<8x1xf32>
    %20 = vector.broadcast %19 : vector<8x1xf32> to vector<8x128xf32>
    %21 = arith.subf %15, %20 : vector<8x128xf32>
    %c0_12 = arith.constant 0 : index
    %c0_13 = arith.constant 0 : index
    %22 = vector.load %arg6[%c0_12, %c0_13] : memref<8x128xf32, #tpu.memory_space<vmem>>, vector<8x128xf32>
    tpu.vector_store %arg6[%c0_12, %c0_13], %21 {strides = array<i32>} : memref<8x128xf32, #tpu.memory_space<vmem>>, vector<8x128xf32>,
    return
  }
  func.func @transform_0(%arg0: i32) -> (i32, i32) {
    %c0_i32 = arith.constant 0 : i32
    %c0_i32_0 = arith.constant 0 : i32
    return %arg0, %c0_i32 : i32, i32
  }
  func.func @transform_1(%arg0: i32) -> (i32, i32) {
    %c0_i32 = arith.constant 0 : i32
    %c0_i32_0 = arith.constant 0 : i32
    %c0_i32_1 = arith.constant 0 : i32
    return %c0_i32, %c0_i32_0 : i32, i32
  }
  func.func @transform_2(%arg0: i32) -> (i32, i32) {
    %c0_i32 = arith.constant 0 : i32
    %c0_i32_0 = arith.constant 0 : i32
    %c0_i32_1 = arith.constant 0 : i32
    return %c0_i32, %c0_i32_0 : i32, i32
  }
  func.func @transform_3(%arg0: i32) -> (i32, i32) {
    %c0_i32 = arith.constant 0 : i32
    %c0_i32_0 = arith.constant 0 : i32
    %c0_i32_1 = arith.constant 0 : i32
    return %c0_i32, %c0_i32_0 : i32, i32
  }
  func.func @transform_4(%arg0: i32) -> (i32, i32) {
    %c0_i32 = arith.constant 0 : i32
    %c0_i32_0 = arith.constant 0 : i32
    %c0_i32_1 = arith.constant 0 : i32
    return %c0_i32, %c0_i32_0 : i32, i32
  }
  func.func @transform_5(%arg0: i32) -> (i32, i32) {
    %c0_i32 = arith.constant 0 : i32
    %c0_i32_0 = arith.constant 0 : i32
    return %arg0, %c0_i32 : i32, i32
  }
}

</mosaic_0001>

<bundles_post_ra>
// kernel: tpu_custom_call.1
= control target key start
LH: loop header
LB: loop body
LE: loop exit
PB: predicated region body
PF: predicated region fallthrough
CT: control target
= control target key end

     0   :  { %v361_v3 = vmov 0.0|0.0   ;;  %vm362_vm0 = vmmov 0   ;;  %v363_v6 = vmov 0.0   ;;  %s476_s0 = inlined_call_operand.vmem [shape: f32[8,128], index: 0, kind: input, shape index: {}]   ;;  %s477_s1 = inlined_call_operand.vmem [shape: f32[128,32], index: 1, kind: input, shape index: {}]   ;;  %s478_s2 = inlined_call_operand.vmem [shape: f32[1,32], index: 2, kind: input, shape index: {}]   ;;  %s479_s3 = inlined_call_operand.vmem [shape: f32[32,128], index: 3, kind: input, shape index: {}]   ;;  %s480_s4 = inlined_call_operand.vmem [shape: f32[1,128], index: 4, kind: input, shape index: {}]   ;;  %s481_s5 = inlined_call_operand.hbm [shape: f32[8,128], index: 5, kind: output, shape index: {}]  }
   0x1   :  { %v22_v0 = vld [vmem:[%s477_s1] sm:$0xff]  ;;  %v23_v1 = vld [vmem:[%s477_s1 + $0x8] sm:$0xff]  ;;  %v24_v2 = vld [vmem:[%s477_s1 + $0x10] sm:$0xff]  ;;  %297 = vmatprep.subr.bf16.mxu0 %v361_v3  ;;  %283 = vmatprep.mubr.msk.f32.mxu0 %vm362_vm0, %v363_v6 }
   0x2   :  { %v298_v4 = vpack.c.bf16 %v23_v1, %v22_v0  ;;  %v25_v5 = vld [vmem:[%s477_s1 + $0x18] sm:$0xff]  ;;  %321 = vmatprep.subr.bf16.mxu1 %v361_v3  ;;  %294 = vmatprep.mubr.msk.f32.mxu1 %vm362_vm0, %v363_v6  ;;  %v26_v8 = vld [vmem:[%s477_s1 + $0x20] sm:$0xff]  ;;  %v27_v9 = vld [vmem:[%s477_s1 + $0x28] sm:$0xff] }
   0x3   :  { %v301_v7 = vpack.c.bf16 %v25_v5, %v24_v2 }
   0x4   :  { %299 = vmatpush3.bf16.msra.mxu0 %v298_v4 }
   0x5   :  { %300 = vmatprep.subr.bf16.mxu0 %v361_v3 }
   0x6   :  { %10 = vsyncpa [#allocation3], 0  ;;  %v304_v10 = vpack.c.bf16 %v27_v9, %v26_v8  ;;  %v28_v11 = vld [vmem:[%s477_s1 + $0x30] sm:$0xff]  ;;  %v29_v12 = vld [vmem:[%s477_s1 + $0x38] sm:$0xff]  ;;  %vm127_vm1 = vcmask 261120  }
   0x7   :  { %v307_v13 = vpack.c.bf16 %v29_v12, %v28_v11  ;;  %v30_v14 = vld [vmem:[%s477_s1 + $0x40] sm:$0xff]  ;;  %v31_v15 = vld [vmem:[%s477_s1 + $0x48] sm:$0xff]  ;;  %v32_v17 = vld [vmem:[%s477_s1 + $0x50] sm:$0xff] }
   0x8   :  { %302 = vmatpush3.bf16.msra.mxu0 %v301_v7  ;;  %v310_v16 = vpack.c.bf16 %v31_v15, %v30_v14  ;;  %v33_v18 = vld [vmem:[%s477_s1 + $0x58] sm:$0xff]  ;;  %v34_v20 = vld [vmem:[%s477_s1 + $0x60] sm:$0xff]  ;;  %v35_v21 = vld [vmem:[%s477_s1 + $0x68] sm:$0xff] }
   0x9   :  { %303 = vmatprep.subr.bf16.mxu0 %v361_v3  ;;  %v313_v19 = vpack.c.bf16 %v33_v18, %v32_v17  ;;  %v316_v22 = vpack.c.bf16 %v35_v21, %v34_v20  ;;  %v36_v23 = vld [vmem:[%s477_s1 + $0x70] sm:$0xff]  ;;  %v37_v24 = vld [vmem:[%s477_s1 + $0x78] sm:$0xff]  ;;  %v21_v26 = vld [vmem:[%s476_s0] sm:$0xff] }
   0xa   :  { %v319_v25 = vpack.c.bf16 %v37_v24, %v36_v23  ;;  %v116_v27 = vld [vmem:[%s479_s3] sm:$0xff]  ;;  %v117_v28 = vld [vmem:[%s479_s3 + $0x8] sm:$0xff]  ;;  %v118_v29 = vld [vmem:[%s479_s3 + $0x10] sm:$0xff] }
   0xb   :  { %v322_v30 = vpack.c.bf16 %v117_v28, %v116_v27  ;;  %v119_v31 = vld [vmem:[%s479_s3 + $0x18] sm:$0xff]  ;;  %v226_v33 = vld [vmem:[%s478_s2] ss:$0 sm:$0xff]  ;;  %s364_s2 = smov [#allocation2]  }
   0xc   :  { %305 = vmatpush3.bf16.msra.mxu0 %v304_v10  ;;  %v325_v32 = vpack.c.bf16 %v119_v31, %v118_v29  ;;  %v227_v38 = vld [vmem:[%s480_s4] ss:$0 sm:$0xff]  ;;  %s218_s3 = sshll.u32 %s364_s2, 4  ;;  %s219_s3 = int_to_ptr.vmem [resolvable:$true] %s218_s3 }
   0xd   :  { %306 = vmatprep.subr.bf16.mxu0 %v361_v3  ;;  %323 = vmatpush3.bf16.msra.mxu1 %v322_v30  ;;  %s337_s4 = scalar_lea.vmem %s219_s3, 128  ;;  %p342_p1 = scmp.lt.s32.totalorder %s219_s3, %s219_s3 }
   0xe   :  { %324 = vmatprep.subr.bf16.mxu1 %v361_v3  ;;  %p338_p0 = scmp.ne.s32.totalorder %s219_s3, %s337_s4  ;;  %p343_p2 = scmp.lt.s32.totalorder %s337_s4, %s337_s4 }
  0x10   :  { %308 = vmatpush3.bf16.msra.mxu0 %v307_v13  ;;  %p344_p3 = por %p343_p2, %p342_p1 }
  0x11   :  { %309 = vmatprep.subr.bf16.mxu0 %v361_v3  ;;  %326 = vmatpush3.bf16.msra.mxu1 %v325_v32 }
  0x12   :  { %p345_p4 = pnand %p344_p3, %p338_p0 }
  0x14   :  { %311 = vmatpush3.bf16.msra.mxu0 %v310_v16 }
  0x15   :  { %312 = vmatprep.subr.bf16.mxu0 %v361_v3 }
  0x18   :  { %314 = vmatpush3.bf16.msra.mxu0 %v313_v19 }
  0x19   :  { %315 = vmatprep.subr.bf16.mxu0 %v361_v3 }
  0x1c   :  { %317 = vmatpush3.bf16.msra.mxu0 %v316_v22 }
  0x1d   :  { %318 = vmatprep.subr.bf16.mxu0 %v361_v3 }
  0x20   :  { %320 = vmatpush3.bf16.msra.mxu0 %v319_v25 }
  0x23   :  { %284 = vmatmul.mubr.f32.vlgmr.msra.gmra.mrb[0].mxu0 %v21_v26 }
  0xf6   :  { %v111_v34 = vpop.f32.mrb[0].mxu0 }
  0xf7   :  { %v112_v35 = vadd.f32 %v226_v33, %v111_v34  ;;  %v285_v36 = vpop.f32.mrb[1].mxu0 }
  0xf9   :  { %331 = vtanh.f32 %v112_v35 }
 0x103   :  { %v332_v37 = vpop.eup %331 }
 0x104   :  { %295 = vmatmul.mubr.msk.f32.vlgmr.msra.gmra.mrb[0].mxu1 %vm127_vm1, %v332_v37 }
 0x1d7   :  { %v197_v39 = vpop.f32.mrb[0].mxu1 }
 0x1d8   :  { %v198_v40 = vadd.f32 %v227_v38, %v197_v39  ;;  %v296_v41 = vpop.f32.mrb[1].mxu1 }
 0x1da   :  { %201 = vmax.xlane.f32.xlu0 %v198_v40 }
 0x267   :  { %v202_v42 = vpop.xlane.xlu0 %201 }
 0x268   :  { %v203_v43 = vsub.f32 %v198_v40, %v202_v42 }
 0x26a   :  { %v204_v44 = vmul.f32 1.442695, %v203_v43 }
 0x26c   :  { %333 = vpow2.f32 %v204_v44 }
 0x276   :  { %v334_v45 = vpop.eup %333 }
 0x277   :  { %206 = vadd.xlane.f32.xlu0 %v334_v45 }
 0x304   :  { %v207_v46 = vpop.xlane.xlu0 %206 }
 0x305   :  { %335 = vlog2.f32 %v207_v46 }
 0x30f   :  { %v336_v47 = vpop.eup %335 }
 0x310   :  { %v209_v48 = vmul.f32 0.6931472, %v336_v47 }
 0x312   :  { %v210_v49 = vsub.f32 %v203_v43, %v209_v48 }
 0x314   :  { %211 = vst [vmem:[#allocation2] sm:$0xff] %v210_v49 }
 0x315   :  { %348 = shalt.err (!%p345_p4)
}
 0x316   :  { %s349_s14 = scalar_lea.hbm %s481_s5, 128 }
 0x317   :  { %p350_p5 = scmp.ne.s32.totalorder %s481_s5, %s349_s14  ;;  %p353_p6 = scmp.lt.u32.totalorder %s349_s14, %s481_s5 }
 0x319   :  { %p355_p7 = pnand %p353_p6, %p350_p5 }
 0x31b   :  { %358 = shalt.err (!%p355_p7)
}
 0x31c   :  { %221 = dma.vmem_to_hbm [thread:$0]  %s219_s3, 128, %s481_s5, [#allocation3]  }
 0x31d   :  { %359 = dma.done.wait [#allocation3], 128  }
 0x31e   :  { %360 = vsyncadd [#allocation3], 4294967168 }
 0x31f   :  { %225 = vsyncpa [#allocation3], 1 }

</bundles_post_ra>
